<compile_context>
chip_gen: v7x
topology: tpu7x:2x2x1
jax: 0.10.0
libtpu: 0.0.40
codegen_flags: <defaults>
</compile_context>

<pallas_src>
import jax
import jax.numpy as jnp
from jax import lax
from jax.experimental import pallas as pl
from jax.experimental.pallas import tpu as pltpu


def _round_up(a, b):
    return ((a + b - 1) // b) * b


def _pick_tile(n, max_tile, align):
    """Tile size (multiple of `align`, <= max_tile) such that the padded problem
    splits into >= 2 grid steps whenever possible (v7x megacore + pipelining),
    while staying a single tile for tiny problems."""
    n_al = _round_up(max(n, 1), align)
    tile = min(max_tile, n_al)
    if tile == n_al and n_al >= 2 * align:
        # cap did not bind -> would be a 1-step grid; split into two tiles.
        tile = _round_up(-(-n_al // 2), align)
    return tile


# -----------------------------------------------------------------------------
# Kernel 1: node embedding   y = x @ W^T + b   (K = 5, MXU formulation)
# -----------------------------------------------------------------------------
def _embed_kernel(x_ref, w_ref, b_ref, o_ref):
    # x_ref : (TN, 8)   node features (K=5 zero-padded to 8)
    # w_ref : (8, D)    weight transposed to [in, out], zero-padded rows
    # b_ref : (1, D)    bias
    # o_ref : (TN, D)   f32 output tile (lane-dense: D on lanes)
    #
    # The op is bound by the (TN, D) output write; doing the tiny-K contraction
    # on the MXU (full-f32 precision) keeps the VALU/XLU slots free and is
    # fully hidden behind the store stream.
    acc = jnp.dot(x_ref[...], w_ref[...],
                  preferred_element_type=jnp.float32,
                  precision=lax.Precision.HIGHEST)
    o_ref[...] = acc + b_ref[...]


def node_embedding(x, weight, bias, *, max_tile_n=1024):
    """x: [N, F] f32, weight: [D, F] (torch nn.Linear layout), bias: [D] -> [N, D] f32."""
    N, F = x.shape
    D = weight.shape[0]
    K = _round_up(F, 8)                          # sublane-align the contraction dim

    tile_n = _pick_tile(N, max_tile_n, 8)
    N_pad = _round_up(N, tile_n)

    x_p = jnp.pad(x.astype(jnp.float32), ((0, N_pad - N), (0, K - F)))
    w_t = jnp.pad(weight.astype(jnp.float32).T, ((0, K - F), (0, 0)))   # [K, D]
    b2 = bias.astype(jnp.float32).reshape(1, D)

    out = pl.pallas_call(
        _embed_kernel,
        out_shape=jax.ShapeDtypeStruct((N_pad, D), jnp.float32),
        grid_spec=pltpu.PrefetchScalarGridSpec(
            num_scalar_prefetch=0,
            grid=(N_pad // tile_n,),
            in_specs=[
                pl.BlockSpec((tile_n, K), lambda i: (i, 0)),
                pl.BlockSpec((K, D), lambda i: (0, 0)),
                pl.BlockSpec((1, D), lambda i: (0, 0)),
            ],
            out_specs=pl.BlockSpec((tile_n, D), lambda i: (i, 0)),
        ),
        compiler_params=pltpu.CompilerParams(
            dimension_semantics=("parallel",)),
    )(x_p, w_t, b2)
    return out[:N]


# -----------------------------------------------------------------------------
# Kernel 2: fused edge vectors (gathered endpoints in, lane-dense packed out)
#   r_ij      = pos[col] - pos[row]
#   norm_r_ij = clamp(||r_ij||_2, min=1e-6)
# -----------------------------------------------------------------------------
def _edge_kernel(pr_ref, pc_ref, o_ref):
    # pr_ref / pc_ref : (3, TE)  gathered positions of edge endpoints (edges on lanes)
    # o_ref           : (4, TE)  rows 0..2 = r_ij, row 3 = clamped norm
    d = pc_ref[...] - pr_ref[...]                      # (3, TE)
    dx = d[0:1, :]
    dy = d[1:2, :]
    dz = d[2:3, :]
    sq = dx * dx + dy * dy + dz * dz                   # per-component VPU FMAs
    o_ref[0:3, :] = d                                  # direct row writes, no concat
    o_ref[3:4, :] = jnp.maximum(jnp.sqrt(sq), jnp.float32(1e-6))


def get_edge_vectors(pos, edge_index, *, max_tile_e=2048, lane_dense=False):
    """pos: [N, 3], edge_index: [2, E] int -> (r_ij [E,3], norm_r_ij [E,1]).

    With lane_dense=True returns (r_ij [3,E], norm [1,E]) without the final
    transpose, for downstream kernels that consume edges-on-lanes directly.
    """
    E = edge_index.shape[1]

    tile_e = _pick_tile(E, max_tile_e, 128)
    E_pad = _round_up(E, tile_e)

    row = edge_index[0].astype(jnp.int32)
    col = edge_index[1].astype(jnp.int32)
    if E_pad != E:
        pad = E_pad - E
        # Padded edges point at node 0 for both endpoints -> r = 0, norm = 1e-6;
        # they are sliced off below.
        row = jnp.pad(row, (0, pad))
        col = jnp.pad(col, (0, pad))

    # Real gather (XLA hardware gather along the lane axis of the (3, N) table)
    # instead of an in-kernel one-hot contraction: the edge kernel becomes a
    # trivially mem-bound elementwise pass with no O(N * tile_e) work.
    pos_t = pos.astype(jnp.float32).T                  # (3, N)
    pr = jnp.take(pos_t, row, axis=1)                  # (3, E_pad)
    pc = jnp.take(pos_t, col, axis=1)                  # (3, E_pad)

    out = pl.pallas_call(
        _edge_kernel,
        out_shape=jax.ShapeDtypeStruct((4, E_pad), jnp.float32),
        grid_spec=pltpu.PrefetchScalarGridSpec(
            num_scalar_prefetch=0,
            grid=(E_pad // tile_e,),
            in_specs=[
                pl.BlockSpec((3, tile_e), lambda i: (0, i)),
                pl.BlockSpec((3, tile_e), lambda i: (0, i)),
            ],
            out_specs=pl.BlockSpec((4, tile_e), lambda i: (0, i)),
        ),
        compiler_params=pltpu.CompilerParams(
            dimension_semantics=("parallel",)),
    )(pr, pc)

    r_t = out[0:3, :E]
    n_t = out[3:4, :E]
    if lane_dense:
        return r_t, n_t
    # Layout plumbing back to the torch API shapes [E, 3] / [E, 1].
    return r_t.T, n_t.T


# -----------------------------------------------------------------------------
# Minimal PaiNN wrapper holding the deterministic parameters it can implement.
# -----------------------------------------------------------------------------
class PaiNNPallas:
    def __init__(self, num_rounds=9, state_dim=256, cutoff=5, edge_dim=64, key=None):
        self.num_rounds = num_rounds
        self.state_dim = state_dim
        self.cutoff = cutoff
        self.edge_dim = edge_dim
        key = jax.random.PRNGKey(0) if key is None else key
        kw, kb = jax.random.split(key)
        # torch.nn.Linear(5, state_dim): weight [state_dim, 5], bias [state_dim]
        bound = 1.0 / jnp.sqrt(5.0)
        self.emb_w = jax.random.uniform(kw, (state_dim, 5), jnp.float32, -bound, bound)
        self.emb_b = jax.random.uniform(kb, (state_dim,), jnp.float32, -bound, bound)
        # TODO(synk): PaiNNMessage / PaiNNUpdate / GatedEquivariantBlock /
        #             ContextEmbedding / readout parameters are not defined in
        #             the provided source; omitted.

    def embed_nodes(self, x):
        return node_embedding(x, self.emb_w, self.emb_b)

    def get_edge_vectors(self, pos, edge_index, *, lane_dense=False):
        return get_edge_vectors(pos, edge_index, lane_dense=lane_dense)


if __name__ == "__main__":
    key = jax.random.PRNGKey(0)
    k1, k2, k3 = jax.random.split(key, 3)

    N = 48            # nodes (not a tile multiple -> exercises padding + 2-step grid)
    E = 300           # edges (not a multiple of 128)
    STATE_DIM = 256   # module default

    x = jax.random.normal(k1, (N, 5), jnp.float32)
    pos = jax.random.normal(k2, (N, 3), jnp.float32) * 3.0
    edge_index = jax.random.randint(k3, (2, E), 0, N, jnp.int32)

    model = PaiNNPallas(state_dim=STATE_DIM)

    # --- Pallas kernels ---
    h = model.embed_nodes(x)
    r_ij, norm_r_ij = model.get_edge_vectors(pos, edge_index)
    jax.block_until_ready((h, r_ij, norm_r_ij))

    # --- pure-JAX reference checks ---
    h_ref = jnp.dot(x, model.emb_w.T, precision=lax.Precision.HIGHEST) + model.emb_b
    row, col = edge_index[0], edge_index[1]
    r_ref = pos[col] - pos[row]
    n_ref = jnp.clip(jnp.linalg.norm(r_ref, axis=1, keepdims=True), 1e-6, None)

    assert h.shape == (N, STATE_DIM)
    assert r_ij.shape == (E, 3) and norm_r_ij.shape == (E, 1)
    assert jnp.allclose(h, h_ref, atol=1e-4, rtol=1e-4)
    assert jnp.allclose(r_ij, r_ref, atol=1e-5, rtol=1e-5)
    assert jnp.allclose(norm_r_ij, n_ref, atol=1e-5, rtol=1e-5)

    print("KERNEL_OK")
</pallas_src>

<mosaic_0001>
module attributes {stable_mosaic.version = 11 : i64} {
  func.func @_embed_kernel(%arg0: i32, %arg1: memref<24x8xf32, #tpu.memory_space<vmem>>, %arg2: memref<8x256xf32, #tpu.memory_space<vmem>>, %arg3: memref<1x256xf32, #tpu.memory_space<vmem>>, %arg4: memref<24x256xf32, #tpu.memory_space<vmem>>) attributes {dimension_semantics = [#tpu.dimension_semantics<parallel>], iteration_bounds = array<i64: 2>, scalar_prefetch = 0 : i64, scratch_operands = 0 : i64, tpu.core_type = #tpu.core_type<tc>, window_params = [{transform_indices = @transform_0, window_bounds = array<i64: 24, 8>}, {pipeline_mode = #tpu.pipeline_mode<synchronous>, transform_indices = @transform_1, window_bounds = array<i64: 8, 256>}, {pipeline_mode = #tpu.pipeline_mode<synchronous>, transform_indices = @transform_2, window_bounds = array<i64: 1, 256>}, {transform_indices = @transform_3, window_bounds = array<i64: 24, 256>}]} {
    %c0 = arith.constant 0 : index
    %c0_0 = arith.constant 0 : index
    %0 = vector.load %arg1[%c0, %c0_0] : memref<24x8xf32, #tpu.memory_space<vmem>>, vector<24x8xf32>
    %c0_1 = arith.constant 0 : index
    %c0_2 = arith.constant 0 : index
    %1 = vector.load %arg2[%c0_1, %c0_2] : memref<8x256xf32, #tpu.memory_space<vmem>>, vector<8x256xf32>
    %cst = arith.constant dense<0.000000e+00> : vector<24x256xf32>
    %2 = tpu.matmul %0, %1, %cst {dimension_numbers = #tpu.dot_dimension_numbers<[1], [0], [0], [1], [0, 0, 1, 1], [], []>, precision = #tpu.contract_precision<fp32>} : vector<24x8xf32>, vector<8x256xf32>, vector<24x256xf32> -> vector<24x256xf32>
    %c0_3 = arith.constant 0 : index
    %c0_4 = arith.constant 0 : index
    %3 = vector.load %arg3[%c0_3, %c0_4] : memref<1x256xf32, #tpu.memory_space<vmem>>, vector<1x256xf32>
    %4 = vector.broadcast %3 : vector<1x256xf32> to vector<24x256xf32>
    %5 = arith.addf %2, %4 : vector<24x256xf32>
    %c0_5 = arith.constant 0 : index
    %c0_6 = arith.constant 0 : index
    %6 = vector.load %arg4[%c0_5, %c0_6] : memref<24x256xf32, #tpu.memory_space<vmem>>, vector<24x256xf32>
    tpu.vector_store %arg4[%c0_5, %c0_6], %5 {strides = array<i32>} : memref<24x256xf32, #tpu.memory_space<vmem>>, vector<24x256xf32>,
    return
  }
  func.func @transform_0(%arg0: i32) -> (i32, i32) {
    %c0_i32 = arith.constant 0 : i32
    %c0_i32_0 = arith.constant 0 : i32
    return %arg0, %c0_i32 : i32, i32
  }
  func.func @transform_1(%arg0: i32) -> (i32, i32) {
    %c0_i32 = arith.constant 0 : i32
    %c0_i32_0 = arith.constant 0 : i32
    %c0_i32_1 = arith.constant 0 : i32
    return %c0_i32, %c0_i32_0 : i32, i32
  }
  func.func @transform_2(%arg0: i32) -> (i32, i32) {
    %c0_i32 = arith.constant 0 : i32
    %c0_i32_0 = arith.constant 0 : i32
    %c0_i32_1 = arith.constant 0 : i32
    return %c0_i32, %c0_i32_0 : i32, i32
  }
  func.func @transform_3(%arg0: i32) -> (i32, i32) {
    %c0_i32 = arith.constant 0 : i32
    %c0_i32_0 = arith.constant 0 : i32
    return %arg0, %c0_i32 : i32, i32
  }
}

</mosaic_0001>

<bundles_post_ra>
// kernel: tpu_custom_call.1
= control target key start
LH: loop header
LB: loop body
LE: loop exit
PB: predicated region body
PF: predicated region fallthrough
CT: control target
= control target key end

     0   :  { %8 = vsyncpa [#allocation3], 0  ;;  %s1157_s0 = inlined_call_operand.vmem [shape: f32[48,8], index: 0, kind: input, shape index: {}]   ;;  %s1158_s1 = inlined_call_operand.vmem [shape: f32[8,256], index: 1, kind: input, shape index: {}]   ;;  %s1159_s2 = inlined_call_operand.vmem [shape: f32[1,256], index: 2, kind: input, shape index: {}]   ;;  %s1160_s3 = inlined_call_operand.hbm [shape: f32[48,256], index: 3, kind: output, shape index: {}]  }
   0x1   :  { %10 = vsyncpa [#allocation3 + $0x1], 0  ;;  %s1024_s12 = smov 0   ;;  %s1026_s13 = smov 0  }
   0x2   :  { %s1028_s14 = smov 0   ;;  %s1030_s15 = smov 0  }
   0x3 LB: > { %s1045_s16 = sadd.s32 4294967295, %s998_s15   ;;  %s845_s17 = sadd.s32 4294967294, %s998_s15   ;;  %s998_s15 = sphi %s1030_s15, %s1166_s15   ;;  %s994_s14 = sphi %s1028_s14, %s1165_s14   ;;  %s990_s13 = sphi %s1026_s13, %s1164_s13   ;;  %s986_s12 = sphi %s1024_s12, %s1163_s12  }
   0x4   : > { %s1049_s18 = sadd.s32 1, %s998_s15   ;;  %s91_s19 = sadd.s32 1, %s994_s14 }
   0x5   : > { %s88_s20 = ssub.s32 %s998_s15, %s1049_s18  ;;  %p101_p0 = scmp.ne.s32.totalorder %s994_s14, %s990_s13 }
   0x6   : > { %p89_p1 = scmp.eq.s32.totalorder %s88_s20, 0  ;;  %p102_p2 = scmp.eq.s32.totalorder %s1045_s16, 1 }
   0x7   : > { %p107_p3 = scmp.ne.s32.totalorder %s990_s13, %s986_s12  ;;  %p108_p4 = scmp.eq.s32.totalorder %s845_s17, 1 }
   0x8   : > { %s1060_s21 = scalar_select %p89_p1, %s994_s14, %s91_s19  }
   0x9   : > { %p1062_p5 = por %p102_p2, %p101_p0  ;;  %p1066_p6 = por %p108_p4, %p107_p3 }
   0xa   : > { %p848_p7 = scmp.ge.s32.totalorder %s998_s15, 1  ;;  %p141_p8 = scmp.lt.s32.totalorder %s998_s15, 3 }
   0xc   : > { %p142_p9 = pnand %p848_p7, %p141_p8 }
   0xd   : > { %v176_v0 = vld [vmem:[%s1158_s1 + $0x8] sm:$0xff] (!%p142_p9)  ;;  %v175_v1 = vld [vmem:[%s1158_s1] sm:$0xff] (!%p142_p9)  ;;  %s165_s28 = smul.u32 (!%p142_p9), 3, %s1045_s16  ;;  %v1000_v4 = vmov (!%p142_p9), 0.0   ;;  %vm189_vm0 = vcmask (!%p142_p9), 64512   ;;  %v179_v34 = vlaneseq (!%p142_p9)  ;;  %s162_s8 = sand.u32 (!%p142_p9), 1, %s990_s13  }
   0xe   : > { %145 = sbr.rel (%p142_p9) target bundleno = 300 (0x12c), region = 32  ;;  %v199_v2 = vand.u32 (!%p142_p9), 4294901760, %v176_v0  ;;  %v201_v3 = vand.u32 (!%p142_p9), 4294901760, %v175_v1  ;;  %554 = vmatprep.mubr.f32.mxu0 (!%p142_p9), %v1000_v4  ;;  %265 = vmatprep.mubr.f32.mxu1 (!%p142_p9), %v1000_v4  ;;  %v177_v37 = vld [vmem:[%s1159_s2] sm:$0x3] (!%p142_p9)  ;;  %s1001_s26 = smov (!%p142_p9), [#allocation2]  }
   0xf   : > { %p166_p10 = scmp.lt.s32.totalorder (!%p142_p9), %s165_s28, 5  ;;  %v180_v35 = vshrl.u32 (!%p142_p9), %v179_v34, 7  ;;  %s893_s9 = smul.u32 (!%p142_p9), 48, %s162_s8 }
  0x10   : > { %489 = vmatprep.subr.mxu0 (!%p142_p9), %v199_v2  ;;  %200 = vmatprep.subr.mxu1 (!%p142_p9), %v199_v2  ;;  %v300_v5 = vsub.f32 (!%p142_p9), %v176_v0, %v199_v2  ;;  %v306_v6 = vsub.f32 (!%p142_p9), %v175_v1, %v201_v3  ;;  %s856_s11 = smul.u32 (!%p142_p9), 768, %s1045_s16  ;;  %s1116_s16 = scalar_lea.sflag (!%p142_p9), [#allocation3], %s162_s8 }
  0x11   : > { %491 = vmatpush1.msra.mxu0 (!%p142_p9), %v201_v3  ;;  %202 = vmatpush1.msra.mxu1 (!%p142_p9), %v201_v3  ;;  %v181_v36 = vsub.s32 (!%p142_p9), 0, %v180_v35  ;;  %v185_v38 = vsub.s32 (!%p142_p9), 1, %v180_v35  ;;  %s164_s10 = scalar_lea.vmem (!%p142_p9), [#allocation2], %s893_s9  ;;  %s940_s27 = sshll.u32 (!%p142_p9), %s1001_s26, 4  ;;  %s941_s27 = int_to_ptr.vmem [resolvable:$false] %s940_s27 }
  0x12   : > { %v301_v7 = vand.u32 (!%p142_p9), 4294901760, %v300_v5  ;;  %v307_v14 = vand.u32 (!%p142_p9), 4294901760, %v306_v6  ;;  %s783_s17 = sshll.u32 (!%p142_p9), %s164_s10, 4  ;;  %s1112_s24 = scalar_lea.hbm (!%p142_p9), %s1160_s3, %s856_s11  ;;  %s1107_s17 = int_to_ptr.vmem [resolvable:$true] %s783_s17 }
  0x13   : > { %v182_v41 = vrot.slane (!%p142_p9), %v177_v37, %v181_v36  ;;  %v186_v42 = vrot.slane (!%p142_p9), %v177_v37, %v185_v38  ;;  %s936_s25 = scalar_lea.vmem (!%p142_p9), %s1107_s17, 768  ;;  %p943_p0 = scmp.lt.s32.totalorder (!%p142_p9), %s1107_s17, %s941_s27 }
  0x14   : > { %v302_v8 = vsub.f32 (!%p142_p9), %v300_v5, %v301_v7  ;;  %585 = vmatprep.subr.mxu0 (!%p142_p9), %v301_v7  ;;  %v308_v22 = vsub.f32 (!%p142_p9), %v306_v6, %v307_v14  ;;  %p937_p11 = scmp.ne.s32.totalorder (!%p142_p9), %s1107_s17, %s936_s25 }
  0x15   : > { %s1168_s28 = smov (!%p166_p10, %s165_s28), 5 }
  0x16   : > { %s849_s29 = sshll.u32 %s1168_s28, 3  ;;  %v303_v13 = vand.u32 4294901760, %v302_v8  ;;  %v309_v29 = vand.u32 4294901760, %v308_v22  ;;  %p938_p12 = pnand %p937_p11, %p1062_p5 }
  0x17   : > { %s169_s5 = scalar_lea.vmem %s1157_s0, %s849_s29  ;;  %s942_s28 = scalar_lea.vmem %s941_s27, 1536 }
  0x18   : > { %v172_v9 = vld [vmem:[%s169_s5] sm:$0xff]  ;;  %v173_v10 = vld [vmem:[%s169_s5 + $0x8] sm:$0xff]  ;;  %v174_v11 = vld [vmem:[%s169_s5 + $0x10] sm:$0xff]  ;;  %304 = vmatprep.subr.mxu1 %v303_v13  ;;  %p939_p13 = pneg %p938_p12  ;;  %p944_p1 = scmp.lt.s32.totalorder %s942_s28, %s936_s25 }
  0x19   : > { %v191_v12 = vsel %vm189_vm0, %v172_v9, 0  ;;  %v194_v15 = vsel %vm189_vm0, %v173_v10, 0  ;;  %v197_v18 = vsel %vm189_vm0, %v174_v11, 0 }
  0x1a   : > { %v266_v16 = vand.u32 4294901760, %v191_v12  ;;  %v277_v17 = vand.u32 4294901760, %v194_v15  ;;  %v288_v19 = vand.u32 4294901760, %v197_v18  ;;  %p945_p2 = por %p944_p1, %p943_p0 }
  0x1c   : > { %v267_v20 = vsub.f32 %v191_v12, %v266_v16  ;;  %v278_v21 = vsub.f32 %v194_v15, %v277_v17  ;;  %v289_v23 = vsub.f32 %v197_v18, %v288_v19  ;;  %p946_p3 = pnand %p945_p2, %p939_p13 }
  0x1e   : > { %v268_v24 = vand.u32 4294901760, %v267_v20  ;;  %v279_v25 = vand.u32 4294901760, %v278_v21  ;;  %v290_v28 = vand.u32 4294901760, %v289_v23 }
  0x20   : > { %558 = vmatmul.mubr.f32.vlgmr.msra.gmra.mrb[0].mxu0 %v268_v24  ;;  %v269_v26 = vsub.f32 %v267_v20, %v268_v24  ;;  %v280_v27 = vsub.f32 %v278_v21, %v279_v25  ;;  %v291_v32 = vsub.f32 %v289_v23, %v290_v28 }
  0x21   : > { %563 = vmatprep.mubr.f32.mxu0 %v1000_v4  ;;  %589 = vmatpush1.msra.mxu0 %v307_v14 }
  0x22   : > { %v270_v30 = vand.u32 4294901760, %v269_v26  ;;  %675 = vmatprep.subr.mxu0 %v199_v2  ;;  %v281_v31 = vand.u32 4294901760, %v280_v27  ;;  %v292_v33 = vand.u32 4294901760, %v291_v32 }
  0x24   : > { %271 = vmatmul.mubr.f32.vlgmr.msra.gmra.mrb[0].mxu1 %v270_v30  ;;  %567 = vmatmul.mubr.f32.gmra.mrb[2].mxu0 %v279_v25 }
  0x25   : > { %310 = vmatpush1.msra.mxu1 %v309_v29  ;;  %276 = vmatprep.mubr.f32.mxu1 %v1000_v4 }
  0x26   : > { %572 = vmatprep.mubr.f32.mxu0 %v1000_v4  ;;  %397 = vmatprep.subr.mxu1 %v300_v5 }
  0x28   : > { %282 = vmatmul.mubr.f32.gmra.mrb[2].mxu1 %v281_v31  ;;  %576 = vmatmul.mubr.f32.gmra.mrb[4].mxu0 %v290_v28 }
  0x29   : > { %287 = vmatprep.mubr.f32.mxu1 %v1000_v4  ;;  %652 = vmatprep.mubr.f32.mxu0 %v1000_v4 }
  0x2c   : > { %293 = vmatmul.mubr.f32.gmra.mrb[4].mxu1 %v292_v33  ;;  %654 = vmatmul.mubr.f32.vlgmr.msra.gmra.mrb[0].mxu0 %v266_v16 }
  0x2d   : > { %373 = vmatprep.mubr.f32.mxu1 %v1000_v4  ;;  %659 = vmatprep.mubr.f32.mxu0 %v1000_v4 }
  0x2e   : > { %677 = vmatpush1.msra.mxu0 %v201_v3 }
  0x30   : > { %375 = vmatmul.mubr.f32.vlgmr.msra.gmra.mrb[0].mxu1 %v266_v16  ;;  %661 = vmatmul.mubr.f32.gmra.mrb[2].mxu0 %v277_v17 }
  0x31   : > { %400 = vmatpush1.msra.mxu1 %v306_v6  ;;  %380 = vmatprep.mubr.f32.mxu1 %v1000_v4 }
  0x32   : > { %666 = vmatprep.mubr.f32.mxu0 %v1000_v4 }
  0x34   : > { %382 = vmatmul.mubr.f32.gmra.mrb[2].mxu1 %v277_v17  ;;  %668 = vmatmul.mubr.f32.gmra.mrb[4].mxu0 %v288_v19 }
  0x35   : > { %387 = vmatprep.mubr.f32.mxu1 %v1000_v4  ;;  %740 = vmatprep.mubr.f32.mxu0 %v1000_v4 }
  0x38   : > { %389 = vmatmul.mubr.f32.gmra.mrb[4].mxu1 %v288_v19  ;;  %742 = vmatmul.mubr.f32.vlgmr.msra.gmra.mrb[0].mxu0 %v266_v16 }
  0x39   : > { %463 = vmatprep.mubr.f32.mxu1 %v1000_v4  ;;  %747 = vmatprep.mubr.f32.mxu0 %v1000_v4 }
  0x3c   : > { %466 = vmatmul.mubr.f32.vlgmr.msra.gmra.mrb[0].mxu1 %v267_v20  ;;  %749 = vmatmul.mubr.f32.gmra.mrb[2].mxu0 %v277_v17 }
  0x3d   : > { %471 = vmatprep.mubr.f32.mxu1 %v1000_v4  ;;  %754 = vmatprep.mubr.f32.mxu0 %v1000_v4 }
  0x40   : > { %474 = vmatmul.mubr.f32.gmra.mrb[2].mxu1 %v278_v21  ;;  %756 = vmatmul.mubr.f32.gmra.mrb[4].mxu0 %v288_v19 }
  0x41   : > { %479 = vmatprep.mubr.f32.mxu1 %v1000_v4 }
  0x44   : > { %482 = vmatmul.mubr.f32.gmra.mrb[4].mxu1 %v289_v23 }
 0x10b   : > { %v743_v39 = vpop.f32.mrb[0].mxu0 }
 0x10c   : > { %v745_v40 = vpop.f32.mrb[1].mxu0 }
 0x10f   : > { %v467_v43 = vpop.f32.mrb[0].mxu1  ;;  %v750_v44 = vpop.f32.mrb[2].mxu0 }
 0x110   : > { %v857_v45 = vadd.f32 %v467_v43, %v182_v41  ;;  %v469_v46 = vpop.f32.mrb[1].mxu1  ;;  %v752_v47 = vpop.f32.mrb[3].mxu0 }
 0x111   : > { %v859_v48 = vadd.f32 %v469_v46, %v186_v42 }
 0x112   : > { %v858_v49 = vadd.f32 %v857_v45, %v743_v39 }
 0x113   : > { %v860_v50 = vadd.f32 %v859_v48, %v745_v40  ;;  %v475_v51 = vpop.f32.mrb[2].mxu1  ;;  %v757_v52 = vpop.f32.mrb[4].mxu0 }
 0x114   : > { %762 = vst [vmem:[%s164_s10] sm:$0xff] %v858_v49  ;;  %v861_v53 = vadd.f32 %v475_v51, %v182_v41  ;;  %v477_v54 = vpop.f32.mrb[3].mxu1  ;;  %v759_v55 = vpop.f32.mrb[5].mxu0 }
 0x115   : > { %763 = vst [vmem:[%s164_s10 + $0x8] sm:$0xff] %v860_v50  ;;  %v863_v56 = vadd.f32 %v477_v54, %v186_v42 }
 0x116   : > { %v862_v57 = vadd.f32 %v861_v53, %v750_v44 }
 0x117   : > { %v864_v58 = vadd.f32 %v863_v56, %v752_v47  ;;  %v483_v59 = vpop.f32.mrb[4].mxu1 }
 0x118   : > { %764 = vst [vmem:[%s164_s10 + $0x10] sm:$0xff] %v862_v57  ;;  %v865_v60 = vadd.f32 %v483_v59, %v182_v41  ;;  %v485_v61 = vpop.f32.mrb[5].mxu1 }
 0x119   : > { %765 = vst [vmem:[%s164_s10 + $0x18] sm:$0xff] %v864_v58  ;;  %v867_v62 = vadd.f32 %v485_v61, %v186_v42 }
 0x11a   : > { %v866_v63 = vadd.f32 %v865_v60, %v757_v52 }
 0x11b   : > { %v868_v0 = vadd.f32 %v867_v62, %v759_v55 }
 0x11c   : > { %766 = vst [vmem:[%s164_s10 + $0x20] sm:$0xff] %v866_v63 }
 0x11d   : > { %767 = vst [vmem:[%s164_s10 + $0x28] sm:$0xff] %v868_v0 }
 0x11e   : > { %949 = shalt.err (!%p946_p3)
}
 0x11f   : > { %s950_s29 = scalar_lea.hbm %s1112_s24, 768  ;;  %s954_s5 = scalar_lea.hbm %s1160_s3, 1536 }
 0x120   : > { %p951_p4 = scmp.ne.s32.totalorder %s1112_s24, %s950_s29  ;;  %p955_p9 = scmp.lt.u32.totalorder %s1112_s24, %s1160_s3 }
 0x121   : > { %p956_p10 = scmp.lt.u32.totalorder %s954_s5, %s950_s29  ;;  %p958_p12 = scmp.lt.u32.totalorder %s950_s29, %s1112_s24 }
 0x122   : > { %p952_p7 = pnand %p951_p4, %p1062_p5 }
 0x123   : > { %p957_p11 = por %p956_p10, %p955_p9 }
 0x124   : > { %p953_p8 = pneg %p952_p7 }
 0x125   : > { %p959_p13 = por %p958_p12, %p957_p11 }
 0x127   : > { %p960_p0 = pnand %p959_p13, %p953_p8 }
 0x129   : > { %963 = shalt.err (!%p960_p0)
}
 0x12a   : > { %s1002_s8 = smov 256   ;;  %s1003_s9 = smov 16  }
 0x12b   : > { %894 = dma.vmem_to_hbm [thread:$0]  (%p1062_p5), %s1107_s17, 768, %s1112_s24, %s1116_s16, %s1002_s8, %s1002_s8, %s1003_s9  }
 0x12c PF: > { %p900_p1 = scmp.ge.s32.totalorder %s998_s15, 2  ;;  %s798_s10 = sand.u32 1, %s986_s12  }
 0x12d   : > { %s799_s11 = scalar_lea.sflag [#allocation3], %s798_s10 }
 0x12e   : > { %p897_p2 = pnand %p900_p1, %p1066_p6 }
 0x130   : > { %981 = dma.done.wait (!%p897_p2), %s799_s11, 768  }
 0x131   : > { %983 = vsyncadd (!%p897_p2), %s799_s11, 4294966528  ;;  %p13_p3 = scmp.ge.s32.totalorder %s1049_s18, 4   ;;  %s1163_s12 = smov %s990_s13 }
 0x132   : > { %s1164_s13 = smov %s994_s14  ;;  %s1165_s14 = smov %s1060_s21 }
 0x133   : > { %s1166_s15 = smov %s1049_s18  ;;  %15 = sbr.rel (!%p13_p3) target bundleno = 3 (0x3), region = 67 }
 0x13a   :  { %804 = vsyncpa [#allocation3], 1 }
 0x13b   :  { %806 = vsyncpa [#allocation3 + $0x1], 1 }

</bundles_post_ra>
